<compile_context>
chip_gen: v7x
topology: tpu7x:2x2x1
jax: 0.10.0
libtpu: 0.0.40
codegen_flags: <defaults>
</compile_context>

<pallas_src>
import functools

import jax
import jax.numpy as jnp
from jax import lax
from jax.experimental import pallas as pl
from jax.experimental.pallas import tpu as pltpu


# -----------------------------------------------------------------------------
# Kernel 1: tiled linear  y = x @ w + b
# -----------------------------------------------------------------------------
def _linear_kernel(x_ref, w_ref, b_ref, o_ref):
    acc = jnp.dot(x_ref[...], w_ref[...], preferred_element_type=jnp.float32)
    o_ref[...] = (acc + b_ref[...].astype(jnp.float32)).astype(o_ref.dtype)


def _pick_row_tile(m, max_tile=512):
    if m <= max_tile:
        return m
    for t in range(max_tile, 7, -8):
        if m % t == 0:
            return t
    return m


def linear(x, w, b):
    """x: (M, K), w: (K, N), b: (N,) -> (M, N)."""
    m, k = x.shape
    _, n = w.shape
    tm = _pick_row_tile(m)
    return pl.pallas_call(
        _linear_kernel,
        out_shape=jax.ShapeDtypeStruct((m, n), x.dtype),
        grid=(m // tm,),
        in_specs=[
            pl.BlockSpec((tm, k), lambda i: (i, 0)),
            pl.BlockSpec((k, n), lambda i: (0, 0)),
            pl.BlockSpec((1, n), lambda i: (0, 0)),
        ],
        out_specs=pl.BlockSpec((tm, n), lambda i: (i, 0)),
        compiler_params=pltpu.CompilerParams(
            dimension_semantics=("parallel",)),
    )(x, w, b.reshape(1, n))


# -----------------------------------------------------------------------------
# Kernel 2: per-(batch*head) scaled dot-product attention with softmax
# -----------------------------------------------------------------------------
def _attention_kernel(q_ref, k_ref, v_ref, o_ref):
    d = q_ref.shape[-1]
    scale = 1.0 / float(d) ** 0.5
    q = q_ref[0].astype(jnp.float32) * scale          # (L, D)
    k = k_ref[0].astype(jnp.float32)                  # (L, D)
    v = v_ref[0].astype(jnp.float32)                  # (L, D)
    # scores = q @ k^T (contract the head dim of both operands; no explicit T)
    s = lax.dot_general(q, k, (((1,), (1,)), ((), ())),
                        preferred_element_type=jnp.float32)   # (L, L)
    s = s - jnp.max(s, axis=-1, keepdims=True)
    p = jnp.exp(s)
    p = p / jnp.sum(p, axis=-1, keepdims=True)
    o_ref[0] = jnp.dot(p, v, preferred_element_type=jnp.float32).astype(o_ref.dtype)


def attention(q, k, v):
    """q, k, v: (BH, L, D) -> (BH, L, D)."""
    bh, l, d = q.shape
    spec = pl.BlockSpec((1, l, d), lambda h: (h, 0, 0))
    return pl.pallas_call(
        _attention_kernel,
        out_shape=jax.ShapeDtypeStruct((bh, l, d), q.dtype),
        grid=(bh,),
        in_specs=[spec, spec, spec],
        out_specs=spec,
        compiler_params=pltpu.CompilerParams(
            dimension_semantics=("parallel",)),
    )(q, k, v)


# -----------------------------------------------------------------------------
# Kernel 3: fused ReLU -> BatchNorm1d (batch statistics) -> residual add
# Operates on channel-major slabs (C, B*L): BN stats reduce the lane axis only.
# -----------------------------------------------------------------------------
def _relu_bn_add_kernel(x_ref, a_ref, g_ref, b_ref, o_ref, *, eps, inv_n):
    a = jnp.maximum(a_ref[...].astype(jnp.float32), 0.0)        # ReLU, (C, B*L)
    mean = jnp.sum(a, axis=1, keepdims=True) * inv_n             # (C, 1)
    diff = a - mean
    var = jnp.sum(diff * diff, axis=1, keepdims=True) * inv_n    # biased var
    y = diff * lax.rsqrt(var + eps) * g_ref[...] + b_ref[...]    # gamma/beta (C,1)
    o_ref[...] = (x_ref[...].astype(jnp.float32) + y).astype(o_ref.dtype)


def relu_bn_add(x_cm, a_cm, gamma, beta, *, eps=1e-5):
    """x_cm, a_cm: (C, B*L); gamma, beta: (C,). Single full block: BN stats
    need the whole (B*L) extent per channel."""
    c, m = x_cm.shape
    kernel = functools.partial(_relu_bn_add_kernel, eps=eps, inv_n=1.0 / m)
    return pl.pallas_call(
        kernel,
        out_shape=jax.ShapeDtypeStruct((c, m), x_cm.dtype),
        grid=(1,),
        in_specs=[
            pl.BlockSpec((c, m), lambda i: (0, 0)),
            pl.BlockSpec((c, m), lambda i: (0, 0)),
            pl.BlockSpec((c, 1), lambda i: (0, 0)),
            pl.BlockSpec((c, 1), lambda i: (0, 0)),
        ],
        out_specs=pl.BlockSpec((c, m), lambda i: (0, 0)),
        compiler_params=pltpu.CompilerParams(
            dimension_semantics=("arbitrary",)),
    )(x_cm, a_cm, gamma.reshape(c, 1), beta.reshape(c, 1))


# -----------------------------------------------------------------------------
# One Transformer layer + full forward (layout plumbing in XLA, compute in Pallas)
# -----------------------------------------------------------------------------
def _transformer_layer(x, p, num_heads):
    b, c, l = x.shape
    e = c
    d = e // num_heads

    # (B, C, L) -> (L, B, C) -> rows (L*B, E)
    x_rows = jnp.transpose(x, (2, 0, 1)).reshape(l * b, e)

    # in_proj: (L*B, 3E)
    qkv = linear(x_rows, jnp.transpose(p["w_in"]), p["b_in"])
    qkv = qkv.reshape(l, b, 3, num_heads, d)
    qkv = jnp.transpose(qkv, (2, 1, 3, 0, 4))            # (3, B, H, L, D)
    q = qkv[0].reshape(b * num_heads, l, d)
    k = qkv[1].reshape(b * num_heads, l, d)
    v = qkv[2].reshape(b * num_heads, l, d)

    att = attention(q, k, v)                              # (B*H, L, D)

    # merge heads back: (B*H, L, D) -> (L, B, E) -> rows (L*B, E)
    att_rows = jnp.transpose(att.reshape(b, num_heads, l, d),
                             (2, 0, 1, 3)).reshape(l * b, e)

    # out_proj: (L*B, E)
    out = linear(att_rows, jnp.transpose(p["w_out"]), p["b_out"])

    # channel-major slabs (C, B*L) for fused ReLU + BN + residual
    out_cm = jnp.transpose(out.reshape(l, b, e), (2, 1, 0)).reshape(e, b * l)
    x_cm = jnp.transpose(x, (1, 0, 2)).reshape(c, b * l)

    y_cm = relu_bn_add(x_cm, out_cm, p["gamma"], p["beta"])
    return jnp.transpose(y_cm.reshape(c, b, l), (1, 0, 2))   # (B, C, L)


def transformer_forward(x, params_list, num_heads):
    b, c, h, w = x.shape
    xr = x.reshape(b, c, h * w)
    for p in params_list:
        xr = _transformer_layer(xr, p, num_heads)
    return xr.reshape(b, c, h, w)


# -----------------------------------------------------------------------------
# Pure-JAX reference (matches PyTorch forward in train mode, dropout=0)
# -----------------------------------------------------------------------------
def reference_forward(x, params_list, num_heads, eps=1e-5):
    hp = lax.Precision.HIGHEST
    b, c, h, w = x.shape
    l = h * w
    e = c
    d = e // num_heads
    xr = x.reshape(b, c, l)
    for p in params_list:
        a = jnp.transpose(xr, (2, 0, 1))                                # (L, B, E)
        qkv = jnp.matmul(a, p["w_in"].T, precision=hp) + p["b_in"]      # (L, B, 3E)
        q, k, v = jnp.split(qkv, 3, axis=-1)

        def split_heads(t):
            return jnp.transpose(t.reshape(l, b, num_heads, d), (1, 2, 0, 3))

        qh, kh, vh = split_heads(q), split_heads(k), split_heads(v)
        s = jnp.einsum("bhqd,bhkd->bhqk", qh, kh, precision=hp) / (d ** 0.5)
        pw = jax.nn.softmax(s, axis=-1)
        oh = jnp.einsum("bhqk,bhkd->bhqd", pw, vh, precision=hp)        # (B, H, L, D)
        o = jnp.transpose(oh, (2, 0, 1, 3)).reshape(l, b, e)
        o = jnp.matmul(o, p["w_out"].T, precision=hp) + p["b_out"]
        o = jnp.maximum(o, 0.0)
        o = jnp.transpose(o, (1, 2, 0))                                 # (B, E, L)
        mean = jnp.mean(o, axis=(0, 2), keepdims=True)
        var = jnp.mean((o - mean) ** 2, axis=(0, 2), keepdims=True)
        o = (o - mean) / jnp.sqrt(var + eps)
        o = o * p["gamma"].reshape(1, -1, 1) + p["beta"].reshape(1, -1, 1)
        xr = xr + o
    return xr.reshape(b, c, h, w)


def init_params(key, embed_dim, height):
    params = []
    for _ in range(height):
        key, k1, k2, k3, k4, k5, k6 = jax.random.split(key, 7)
        params.append(dict(
            w_in=0.1 * jax.random.normal(k1, (3 * embed_dim, embed_dim), jnp.float32),
            b_in=0.1 * jax.random.normal(k2, (3 * embed_dim,), jnp.float32),
            w_out=0.1 * jax.random.normal(k3, (embed_dim, embed_dim), jnp.float32),
            b_out=0.1 * jax.random.normal(k4, (embed_dim,), jnp.float32),
            gamma=1.0 + 0.5 * jax.random.normal(k5, (embed_dim,), jnp.float32),
            beta=0.1 * jax.random.normal(k6, (embed_dim,), jnp.float32),
        ))
    return params


if __name__ == "__main__":
    key = jax.random.PRNGKey(0)
    # Small shapes: batch=2, embed_dim=channels=32, num_heads=4, spatial 8x8 (L=64)
    B, C, H, W = 2, 32, 8, 8
    num_heads = 4
    height = 2

    key, kx, kp = jax.random.split(key, 3)
    x = jax.random.normal(kx, (B, C, H, W), dtype=jnp.float32)
    params = init_params(kp, C, height)

    fwd = jax.jit(functools.partial(transformer_forward, num_heads=num_heads))
    out = fwd(x, params)
    out = jax.block_until_ready(out)

    ref = reference_forward(x, params, num_heads)
    assert out.shape == (B, C, H, W)
    assert out.dtype == x.dtype
    max_err = float(jnp.max(jnp.abs(out - ref)))
    assert bool(jnp.allclose(out, ref, rtol=2e-3, atol=2e-3)), max_err

    # TODO(synk): BatchNorm running-stat updates and the (unused) attention-weight
    # output of nn.MultiheadAttention are not modeled (no effect on the forward value).
    print("KERNEL_OK")
</pallas_src>

<mosaic_0001>
module attributes {stable_mosaic.version = 11 : i64} {
  func.func @_linear_kernel(%arg0: i32, %arg1: memref<128x32xf32, #tpu.memory_space<vmem>>, %arg2: memref<32x96xf32, #tpu.memory_space<vmem>>, %arg3: memref<1x96xf32, #tpu.memory_space<vmem>>, %arg4: memref<128x96xf32, #tpu.memory_space<vmem>>) attributes {dimension_semantics = [#tpu.dimension_semantics<parallel>], iteration_bounds = array<i64: 1>, scalar_prefetch = 0 : i64, scratch_operands = 0 : i64, tpu.core_type = #tpu.core_type<tc>, window_params = [{transform_indices = @transform_0, window_bounds = array<i64: 128, 32>}, {pipeline_mode = #tpu.pipeline_mode<synchronous>, transform_indices = @transform_1, window_bounds = array<i64: 32, 96>}, {pipeline_mode = #tpu.pipeline_mode<synchronous>, transform_indices = @transform_2, window_bounds = array<i64: 1, 96>}, {transform_indices = @transform_3, window_bounds = array<i64: 128, 96>}]} {
    %c0 = arith.constant 0 : index
    %c0_0 = arith.constant 0 : index
    %0 = vector.load %arg1[%c0, %c0_0] : memref<128x32xf32, #tpu.memory_space<vmem>>, vector<128x32xf32>
    %c0_1 = arith.constant 0 : index
    %c0_2 = arith.constant 0 : index
    %1 = vector.load %arg2[%c0_1, %c0_2] : memref<32x96xf32, #tpu.memory_space<vmem>>, vector<32x96xf32>
    %cst = arith.constant dense<0.000000e+00> : vector<128x96xf32>
    %2 = tpu.matmul %0, %1, %cst {dimension_numbers = #tpu.dot_dimension_numbers<[1], [0], [0], [1], [0, 0, 1, 1], [], []>} : vector<128x32xf32>, vector<32x96xf32>, vector<128x96xf32> -> vector<128x96xf32>
    %c0_3 = arith.constant 0 : index
    %c0_4 = arith.constant 0 : index
    %3 = vector.load %arg3[%c0_3, %c0_4] : memref<1x96xf32, #tpu.memory_space<vmem>>, vector<1x96xf32>
    %4 = vector.broadcast %3 : vector<1x96xf32> to vector<128x96xf32>
    %5 = arith.addf %2, %4 : vector<128x96xf32>
    %c0_5 = arith.constant 0 : index
    %c0_6 = arith.constant 0 : index
    %6 = vector.load %arg4[%c0_5, %c0_6] : memref<128x96xf32, #tpu.memory_space<vmem>>, vector<128x96xf32>
    tpu.vector_store %arg4[%c0_5, %c0_6], %5 {strides = array<i32>} : memref<128x96xf32, #tpu.memory_space<vmem>>, vector<128x96xf32>,
    return
  }
  func.func @transform_0(%arg0: i32) -> (i32, i32) {
    %c0_i32 = arith.constant 0 : i32
    %c0_i32_0 = arith.constant 0 : i32
    return %arg0, %c0_i32 : i32, i32
  }
  func.func @transform_1(%arg0: i32) -> (i32, i32) {
    %c0_i32 = arith.constant 0 : i32
    %c0_i32_0 = arith.constant 0 : i32
    %c0_i32_1 = arith.constant 0 : i32
    return %c0_i32, %c0_i32_0 : i32, i32
  }
  func.func @transform_2(%arg0: i32) -> (i32, i32) {
    %c0_i32 = arith.constant 0 : i32
    %c0_i32_0 = arith.constant 0 : i32
    %c0_i32_1 = arith.constant 0 : i32
    return %c0_i32, %c0_i32_0 : i32, i32
  }
  func.func @transform_3(%arg0: i32) -> (i32, i32) {
    %c0_i32 = arith.constant 0 : i32
    %c0_i32_0 = arith.constant 0 : i32
    return %arg0, %c0_i32 : i32, i32
  }
}

module attributes {stable_mosaic.version = 11 : i64} {
  func.func @_attention_kernel(%arg0: i32, %arg1: memref<1x64x8xf32, #tpu.memory_space<vmem>>, %arg2: memref<1x64x8xf32, #tpu.memory_space<vmem>>, %arg3: memref<1x64x8xf32, #tpu.memory_space<vmem>>, %arg4: memref<1x64x8xf32, #tpu.memory_space<vmem>>) attributes {dimension_semantics = [#tpu.dimension_semantics<parallel>], iteration_bounds = array<i64: 8>, scalar_prefetch = 0 : i64, scratch_operands = 0 : i64, tpu.core_type = #tpu.core_type<tc>, window_params = [{transform_indices = @transform_0, window_bounds = array<i64: 1, 64, 8>}, {transform_indices = @transform_1, window_bounds = array<i64: 1, 64, 8>}, {transform_indices = @transform_2, window_bounds = array<i64: 1, 64, 8>}, {transform_indices = @transform_3, window_bounds = array<i64: 1, 64, 8>}]} {
    %c0 = arith.constant 0 : index
    %c0_0 = arith.constant 0 : index
    %c0_1 = arith.constant 0 : index
    %0 = vector.load %arg1[%c0, %c0_0, %c0_1] : memref<1x64x8xf32, #tpu.memory_space<vmem>>, vector<1x64x8xf32>
    %1 = vector.shape_cast %0 : vector<1x64x8xf32> to vector<64x8xf32>
    %cst = arith.constant 0.353553385 : f32
    %2 = vector.broadcast %cst : f32 to vector<64x8xf32>
    %3 = arith.mulf %1, %2 : vector<64x8xf32>
    %c0_2 = arith.constant 0 : index
    %c0_3 = arith.constant 0 : index
    %c0_4 = arith.constant 0 : index
    %4 = vector.load %arg2[%c0_2, %c0_3, %c0_4] : memref<1x64x8xf32, #tpu.memory_space<vmem>>, vector<1x64x8xf32>
    %5 = vector.shape_cast %4 : vector<1x64x8xf32> to vector<64x8xf32>
    %c0_5 = arith.constant 0 : index
    %c0_6 = arith.constant 0 : index
    %c0_7 = arith.constant 0 : index
    %6 = vector.load %arg3[%c0_5, %c0_6, %c0_7] : memref<1x64x8xf32, #tpu.memory_space<vmem>>, vector<1x64x8xf32>
    %7 = vector.shape_cast %6 : vector<1x64x8xf32> to vector<64x8xf32>
    %cst_8 = arith.constant dense<0.000000e+00> : vector<64x64xf32>
    %8 = tpu.matmul %3, %5, %cst_8 {dimension_numbers = #tpu.dot_dimension_numbers<[1], [1], [0], [0], [0, 0, 1, 0], [], []>} : vector<64x8xf32>, vector<64x8xf32>, vector<64x64xf32> -> vector<64x64xf32>
    %cst_9 = arith.constant dense<0xFF800000> : vector<64xf32>
    %9 = vector.multi_reduction <maximumf>, %8, %cst_9 [1] : vector<64x64xf32> to vector<64xf32>
    %10 = vector.shape_cast %9 : vector<64xf32> to vector<64x1xf32>
    %11 = vector.broadcast %10 : vector<64x1xf32> to vector<64x64xf32>
    %12 = arith.subf %8, %11 : vector<64x64xf32>
    %13 = math.exp %12 : vector<64x64xf32>
    %cst_10 = arith.constant dense<0.000000e+00> : vector<64xf32>
    %14 = vector.multi_reduction <add>, %13, %cst_10 [1] : vector<64x64xf32> to vector<64xf32>
    %15 = vector.shape_cast %14 : vector<64xf32> to vector<64x1xf32>
    %16 = vector.broadcast %15 : vector<64x1xf32> to vector<64x64xf32>
    %17 = arith.divf %13, %16 : vector<64x64xf32>
    %cst_11 = arith.constant dense<0.000000e+00> : vector<64x8xf32>
    %18 = tpu.matmul %17, %7, %cst_11 {dimension_numbers = #tpu.dot_dimension_numbers<[1], [0], [0], [1], [0, 0, 1, 1], [], []>} : vector<64x64xf32>, vector<64x8xf32>, vector<64x8xf32> -> vector<64x8xf32>
    %c0_12 = arith.constant 0 : index
    %c0_13 = arith.constant 0 : index
    %c0_14 = arith.constant 0 : index
    %19 = vector.load %arg4[%c0_12, %c0_13, %c0_14] : memref<1x64x8xf32, #tpu.memory_space<vmem>>, vector<1x64x8xf32>
    %20 = vector.shape_cast %19 : vector<1x64x8xf32> to vector<64x8xf32>
    %21 = vector.shape_cast %18 : vector<64x8xf32> to vector<1x64x8xf32>
    tpu.vector_store %arg4[%c0_12, %c0_13, %c0_14], %21 {strides = array<i32>} : memref<1x64x8xf32, #tpu.memory_space<vmem>>, vector<1x64x8xf32>,
    return
  }
  func.func @transform_0(%arg0: i32) -> (i32, i32, i32) {
    %c0_i32 = arith.constant 0 : i32
    %c0_i32_0 = arith.constant 0 : i32
    %c0_i32_1 = arith.constant 0 : i32
    return %arg0, %c0_i32, %c0_i32_0 : i32, i32, i32
  }
  func.func @transform_1(%arg0: i32) -> (i32, i32, i32) {
    %c0_i32 = arith.constant 0 : i32
    %c0_i32_0 = arith.constant 0 : i32
    %c0_i32_1 = arith.constant 0 : i32
    return %arg0, %c0_i32, %c0_i32_0 : i32, i32, i32
  }
  func.func @transform_2(%arg0: i32) -> (i32, i32, i32) {
    %c0_i32 = arith.constant 0 : i32
    %c0_i32_0 = arith.constant 0 : i32
    %c0_i32_1 = arith.constant 0 : i32
    return %arg0, %c0_i32, %c0_i32_0 : i32, i32, i32
  }
  func.func @transform_3(%arg0: i32) -> (i32, i32, i32) {
    %c0_i32 = arith.constant 0 : i32
    %c0_i32_0 = arith.constant 0 : i32
    %c0_i32_1 = arith.constant 0 : i32
    return %arg0, %c0_i32, %c0_i32_0 : i32, i32, i32
  }
}

module attributes {stable_mosaic.version = 11 : i64} {
  func.func @_linear_kernel(%arg0: i32, %arg1: memref<128x32xf32, #tpu.memory_space<vmem>>, %arg2: memref<32x32xf32, #tpu.memory_space<vmem>>, %arg3: memref<1x32xf32, #tpu.memory_space<vmem>>, %arg4: memref<128x32xf32, #tpu.memory_space<vmem>>) attributes {dimension_semantics = [#tpu.dimension_semantics<parallel>], iteration_bounds = array<i64: 1>, scalar_prefetch = 0 : i64, scratch_operands = 0 : i64, tpu.core_type = #tpu.core_type<tc>, window_params = [{transform_indices = @transform_0, window_bounds = array<i64: 128, 32>}, {pipeline_mode = #tpu.pipeline_mode<synchronous>, transform_indices = @transform_1, window_bounds = array<i64: 32, 32>}, {pipeline_mode = #tpu.pipeline_mode<synchronous>, transform_indices = @transform_2, window_bounds = array<i64: 1, 32>}, {transform_indices = @transform_3, window_bounds = array<i64: 128, 32>}]} {
    %c0 = arith.constant 0 : index
    %c0_0 = arith.constant 0 : index
    %0 = vector.load %arg1[%c0, %c0_0] : memref<128x32xf32, #tpu.memory_space<vmem>>, vector<128x32xf32>
    %c0_1 = arith.constant 0 : index
    %c0_2 = arith.constant 0 : index
    %1 = vector.load %arg2[%c0_1, %c0_2] : memref<32x32xf32, #tpu.memory_space<vmem>>, vector<32x32xf32>
    %cst = arith.constant dense<0.000000e+00> : vector<128x32xf32>
    %2 = tpu.matmul %0, %1, %cst {dimension_numbers = #tpu.dot_dimension_numbers<[1], [0], [0], [1], [0, 0, 1, 1], [], []>} : vector<128x32xf32>, vector<32x32xf32>, vector<128x32xf32> -> vector<128x32xf32>
    %c0_3 = arith.constant 0 : index
    %c0_4 = arith.constant 0 : index
    %3 = vector.load %arg3[%c0_3, %c0_4] : memref<1x32xf32, #tpu.memory_space<vmem>>, vector<1x32xf32>
    %4 = vector.broadcast %3 : vector<1x32xf32> to vector<128x32xf32>
    %5 = arith.addf %2, %4 : vector<128x32xf32>
    %c0_5 = arith.constant 0 : index
    %c0_6 = arith.constant 0 : index
    %6 = vector.load %arg4[%c0_5, %c0_6] : memref<128x32xf32, #tpu.memory_space<vmem>>, vector<128x32xf32>
    tpu.vector_store %arg4[%c0_5, %c0_6], %5 {strides = array<i32>} : memref<128x32xf32, #tpu.memory_space<vmem>>, vector<128x32xf32>,
    return
  }
  func.func @transform_0(%arg0: i32) -> (i32, i32) {
    %c0_i32 = arith.constant 0 : i32
    %c0_i32_0 = arith.constant 0 : i32
    return %arg0, %c0_i32 : i32, i32
  }
  func.func @transform_1(%arg0: i32) -> (i32, i32) {
    %c0_i32 = arith.constant 0 : i32
    %c0_i32_0 = arith.constant 0 : i32
    %c0_i32_1 = arith.constant 0 : i32
    return %c0_i32, %c0_i32_0 : i32, i32
  }
  func.func @transform_2(%arg0: i32) -> (i32, i32) {
    %c0_i32 = arith.constant 0 : i32
    %c0_i32_0 = arith.constant 0 : i32
    %c0_i32_1 = arith.constant 0 : i32
    return %c0_i32, %c0_i32_0 : i32, i32
  }
  func.func @transform_3(%arg0: i32) -> (i32, i32) {
    %c0_i32 = arith.constant 0 : i32
    %c0_i32_0 = arith.constant 0 : i32
    return %arg0, %c0_i32 : i32, i32
  }
}

module attributes {stable_mosaic.version = 11 : i64} {
  func.func @_relu_bn_add_kernel(%arg0: i32, %arg1: memref<32x128xf32, #tpu.memory_space<vmem>>, %arg2: memref<32x128xf32, #tpu.memory_space<vmem>>, %arg3: memref<32x1xf32, #tpu.memory_space<vmem>>, %arg4: memref<32x1xf32, #tpu.memory_space<vmem>>, %arg5: memref<32x128xf32, #tpu.memory_space<vmem>>) attributes {dimension_semantics = [#tpu.dimension_semantics<arbitrary>], iteration_bounds = array<i64: 1>, scalar_prefetch = 0 : i64, scratch_operands = 0 : i64, tpu.core_type = #tpu.core_type<tc>, window_params = [{pipeline_mode = #tpu.pipeline_mode<synchronous>, transform_indices = @transform_0, window_bounds = array<i64: 32, 128>}, {pipeline_mode = #tpu.pipeline_mode<synchronous>, transform_indices = @transform_1, window_bounds = array<i64: 32, 128>}, {pipeline_mode = #tpu.pipeline_mode<synchronous>, transform_indices = @transform_2, window_bounds = array<i64: 32, 1>}, {pipeline_mode = #tpu.pipeline_mode<synchronous>, transform_indices = @transform_3, window_bounds = array<i64: 32, 1>}, {pipeline_mode = #tpu.pipeline_mode<synchronous>, transform_indices = @transform_4, window_bounds = array<i64: 32, 128>}]} {
    %c0 = arith.constant 0 : index
    %c0_0 = arith.constant 0 : index
    %0 = vector.load %arg2[%c0, %c0_0] : memref<32x128xf32, #tpu.memory_space<vmem>>, vector<32x128xf32>
    %cst = arith.constant 0.000000e+00 : f32
    %1 = vector.broadcast %cst : f32 to vector<32x128xf32>
    %2 = arith.maximumf %0, %1 : vector<32x128xf32>
    %cst_1 = arith.constant dense<0.000000e+00> : vector<32xf32>
    %3 = vector.multi_reduction <add>, %2, %cst_1 [1] : vector<32x128xf32> to vector<32xf32>
    %4 = vector.shape_cast %3 : vector<32xf32> to vector<32x1xf32>
    %cst_2 = arith.constant 7.812500e-03 : f32
    %5 = vector.broadcast %cst_2 : f32 to vector<32x1xf32>
    %6 = arith.mulf %4, %5 : vector<32x1xf32>
    %7 = vector.broadcast %6 : vector<32x1xf32> to vector<32x128xf32>
    %8 = arith.subf %2, %7 : vector<32x128xf32>
    %9 = arith.mulf %8, %8 : vector<32x128xf32>
    %cst_3 = arith.constant dense<0.000000e+00> : vector<32xf32>
    %10 = vector.multi_reduction <add>, %9, %cst_3 [1] : vector<32x128xf32> to vector<32xf32>
    %11 = vector.shape_cast %10 : vector<32xf32> to vector<32x1xf32>
    %cst_4 = arith.constant 7.812500e-03 : f32
    %12 = vector.broadcast %cst_4 : f32 to vector<32x1xf32>
    %13 = arith.mulf %11, %12 : vector<32x1xf32>
    %cst_5 = arith.constant 9.99999974E-6 : f32
    %14 = vector.broadcast %cst_5 : f32 to vector<32x1xf32>
    %15 = arith.addf %13, %14 : vector<32x1xf32>
    %16 = math.rsqrt %15 : vector<32x1xf32>
    %17 = vector.broadcast %16 : vector<32x1xf32> to vector<32x128xf32>
    %18 = arith.mulf %8, %17 : vector<32x128xf32>
    %c0_6 = arith.constant 0 : index
    %c0_7 = arith.constant 0 : index
    %19 = vector.load %arg3[%c0_6, %c0_7] : memref<32x1xf32, #tpu.memory_space<vmem>>, vector<32x1xf32>
    %20 = vector.broadcast %19 : vector<32x1xf32> to vector<32x128xf32>
    %21 = arith.mulf %18, %20 : vector<32x128xf32>
    %c0_8 = arith.constant 0 : index
    %c0_9 = arith.constant 0 : index
    %22 = vector.load %arg4[%c0_8, %c0_9] : memref<32x1xf32, #tpu.memory_space<vmem>>, vector<32x1xf32>
    %23 = vector.broadcast %22 : vector<32x1xf32> to vector<32x128xf32>
    %24 = arith.addf %21, %23 : vector<32x128xf32>
    %c0_10 = arith.constant 0 : index
    %c0_11 = arith.constant 0 : index
    %25 = vector.load %arg1[%c0_10, %c0_11] : memref<32x128xf32, #tpu.memory_space<vmem>>, vector<32x128xf32>
    %26 = arith.addf %25, %24 : vector<32x128xf32>
    %c0_12 = arith.constant 0 : index
    %c0_13 = arith.constant 0 : index
    %27 = vector.load %arg5[%c0_12, %c0_13] : memref<32x128xf32, #tpu.memory_space<vmem>>, vector<32x128xf32>
    tpu.vector_store %arg5[%c0_12, %c0_13], %26 {strides = array<i32>} : memref<32x128xf32, #tpu.memory_space<vmem>>, vector<32x128xf32>,
    return
  }
  func.func @transform_0(%arg0: i32) -> (i32, i32) {
    %c0_i32 = arith.constant 0 : i32
    %c0_i32_0 = arith.constant 0 : i32
    %c0_i32_1 = arith.constant 0 : i32
    return %c0_i32, %c0_i32_0 : i32, i32
  }
  func.func @transform_1(%arg0: i32) -> (i32, i32) {
    %c0_i32 = arith.constant 0 : i32
    %c0_i32_0 = arith.constant 0 : i32
    %c0_i32_1 = arith.constant 0 : i32
    return %c0_i32, %c0_i32_0 : i32, i32
  }
  func.func @transform_2(%arg0: i32) -> (i32, i32) {
    %c0_i32 = arith.constant 0 : i32
    %c0_i32_0 = arith.constant 0 : i32
    %c0_i32_1 = arith.constant 0 : i32
    return %c0_i32, %c0_i32_0 : i32, i32
  }
  func.func @transform_3(%arg0: i32) -> (i32, i32) {
    %c0_i32 = arith.constant 0 : i32
    %c0_i32_0 = arith.constant 0 : i32
    %c0_i32_1 = arith.constant 0 : i32
    return %c0_i32, %c0_i32_0 : i32, i32
  }
  func.func @transform_4(%arg0: i32) -> (i32, i32) {
    %c0_i32 = arith.constant 0 : i32
    %c0_i32_0 = arith.constant 0 : i32
    %c0_i32_1 = arith.constant 0 : i32
    return %c0_i32, %c0_i32_0 : i32, i32
  }
}

</mosaic_0001>

<bundles_post_ra>
// kernel: transformer_forward.8
= control target key start
LH: loop header
LB: loop body
LE: loop exit
PB: predicated region body
PF: predicated region fallthrough
CT: control target
= control target key end

     0   :  { %vm41_vm0 = vcmask 261120   ;;  %vm235_vm1 = vcmask 785408   ;;  %s500_s1 = inlined_call_operand.vmem [shape: f32[32,96], index: 1, kind: input, shape index: {}]   ;;  %s501_s0 = inlined_call_operand.vmem [shape: f32[128,32], index: 0, kind: input, shape index: {}]   ;;  %s502_s2 = inlined_call_operand.vmem [shape: f32[1,96], index: 2, kind: input, shape index: {}]   ;;  %s503_s3 = inlined_call_operand.vmem [shape: f32[128,96], index: 3, kind: output, shape index: {}]  }
   0x1   :  { %v30_v0 = vld [vmem:[%s500_s1] sm:$0xff]  ;;  %v31_v1 = vld [vmem:[%s500_s1 + $0x8] sm:$0xff]  ;;  %v32_v2 = vld [vmem:[%s500_s1 + $0x10] sm:$0xff] }
   0x2   :  { %v325_v3 = vpack.c.bf16 %v31_v1, %v30_v0  ;;  %v33_v4 = vld [vmem:[%s500_s1 + $0x18] sm:$0xff]  ;;  %v14_v5 = vld [vmem:[%s501_s0] sm:$0xff]  ;;  %v15_v8 = vld [vmem:[%s501_s0 + $0x8] sm:$0xff] }
   0x3   :  { %v22_v6 = vld [vmem:[%s501_s0 + $0x40] sm:$0xff]  ;;  %v329_v7 = vpack.c.bf16 %v33_v4, %v32_v2  ;;  %301 = vmatprep.mubr.msk.f32.mxu0 %vm41_vm0, %v14_v5  ;;  %v23_v9 = vld [vmem:[%s501_s0 + $0x48] sm:$0xff]  ;;  %v16_v10 = vld [vmem:[%s501_s0 + $0x10] sm:$0xff] }
   0x4   :  { %313 = vmatprep.mubr.msk.f32.mxu1 %vm41_vm0, %v22_v6  ;;  %326 = vmatprep.subr.bf16.mxu0 %v325_v3  ;;  %v24_v11 = vld [vmem:[%s501_s0 + $0x50] sm:$0xff]  ;;  %v17_v12 = vld [vmem:[%s501_s0 + $0x18] sm:$0xff]  ;;  %v18_v14 = vld [vmem:[%s501_s0 + $0x20] sm:$0xff] }
   0x5   :  { %333 = vmatprep.subr.bf16.mxu1 %v325_v3  ;;  %328 = vmatpush3.bf16.msra.mxu0 %v325_v3  ;;  %v25_v13 = vld [vmem:[%s501_s0 + $0x58] sm:$0xff]  ;;  %v26_v15 = vld [vmem:[%s501_s0 + $0x60] sm:$0xff]  ;;  %v19_v16 = vld [vmem:[%s501_s0 + $0x28] sm:$0xff] }
   0x6   :  { %335 = vmatpush3.bf16.msra.mxu1 %v325_v3  ;;  %330 = vmatprep.subr.bf16.mxu0 %v329_v7  ;;  %v27_v17 = vld [vmem:[%s501_s0 + $0x68] sm:$0xff]  ;;  %v20_v18 = vld [vmem:[%s501_s0 + $0x30] sm:$0xff]  ;;  %v21_v20 = vld [vmem:[%s501_s0 + $0x38] sm:$0xff] }
   0x7   :  { %334 = vmatprep.subr.bf16.mxu1 %v329_v7  ;;  %v28_v19 = vld [vmem:[%s501_s0 + $0x70] sm:$0xff]  ;;  %v29_v21 = vld [vmem:[%s501_s0 + $0x78] sm:$0xff]  ;;  %v256_v22 = vld [vmem:[%s502_s2] ss:$0 sm:$0xff] }
   0x9   :  { %332 = vmatpush3.bf16.msra.mxu0 %v329_v7 }
   0xa   :  { %336 = vmatpush3.bf16.msra.mxu1 %v329_v7 }
   0xc   :  { %302 = vmatmul.mubr.msk.f32.vlgmr.msra.gmra.mrb[0].mxu0 %vm41_vm0, %v15_v8 }
   0xd   :  { %314 = vmatmul.mubr.msk.f32.vlgmr.msra.gmra.mrb[0].mxu1 %vm41_vm0, %v23_v9  ;;  %304 = vmatprep.mubr.msk.f32.mxu0 %vm41_vm0, %v16_v10 }
   0xe   :  { %316 = vmatprep.mubr.msk.f32.mxu1 %vm41_vm0, %v24_v11 }
  0x10   :  { %305 = vmatmul.mubr.msk.f32.gmra.mrb[2].mxu0 %vm41_vm0, %v17_v12 }
  0x11   :  { %317 = vmatmul.mubr.msk.f32.gmra.mrb[2].mxu1 %vm41_vm0, %v25_v13  ;;  %307 = vmatprep.mubr.msk.f32.mxu0 %vm41_vm0, %v18_v14 }
  0x12   :  { %319 = vmatprep.mubr.msk.f32.mxu1 %vm41_vm0, %v26_v15 }
  0x14   :  { %308 = vmatmul.mubr.msk.f32.gmra.mrb[4].mxu0 %vm41_vm0, %v19_v16 }
  0x15   :  { %320 = vmatmul.mubr.msk.f32.gmra.mrb[4].mxu1 %vm41_vm0, %v27_v17  ;;  %310 = vmatprep.mubr.msk.f32.mxu0 %vm41_vm0, %v20_v18 }
  0x16   :  { %322 = vmatprep.mubr.msk.f32.mxu1 %vm41_vm0, %v28_v19 }
  0x18   :  { %311 = vmatmul.mubr.msk.f32.gmra.mrb[6].mxu0 %vm41_vm0, %v21_v20 }
  0x19   :  { %323 = vmatmul.mubr.msk.f32.gmra.mrb[6].mxu1 %vm41_vm0, %v29_v21 }
  0xdf   :  { %v303_v23 = vpop.f32.mrb[0].mxu0 }
  0xe0   :  { %v315_v24 = vpop.f32.mrb[0].mxu1  ;;  %v162_v25 = vadd.f32 %v303_v23, %v256_v22  ;;  %v156_v27 = vpop.f32.mrb[1].mxu0 }
  0xe1   :  { %v202_v26 = vadd.f32 %v315_v24, %v256_v22  ;;  %v196_v28 = vpop.f32.mrb[1].mxu1  ;;  %v157_v29 = vadd.f32 %v256_v22, %v156_v27 }
  0xe2   :  { %v197_v30 = vadd.f32 %v256_v22, %v196_v28  ;;  %237 = vst.msk [vmem:[%s503_s3 + $0x8] sm:$0xff] %vm235_vm1, %v162_v25 }
  0xe3   :  { %245 = vst.msk [vmem:[%s503_s3 + $0x48] sm:$0xff] %vm235_vm1, %v202_v26  ;;  %236 = vst.msk [vmem:[%s503_s3] sm:$0xff] %vm235_vm1, %v157_v29  ;;  %v306_v31 = vpop.f32.mrb[2].mxu0 }
  0xe4   :  { %244 = vst.msk [vmem:[%s503_s3 + $0x40] sm:$0xff] %vm235_vm1, %v197_v30  ;;  %v318_v32 = vpop.f32.mrb[2].mxu1  ;;  %v172_v33 = vadd.f32 %v306_v31, %v256_v22  ;;  %v166_v35 = vpop.f32.mrb[3].mxu0 }
  0xe5   :  { %v212_v34 = vadd.f32 %v318_v32, %v256_v22  ;;  %v206_v36 = vpop.f32.mrb[3].mxu1  ;;  %v167_v37 = vadd.f32 %v256_v22, %v166_v35 }
  0xe6   :  { %v207_v38 = vadd.f32 %v256_v22, %v206_v36  ;;  %239 = vst.msk [vmem:[%s503_s3 + $0x18] sm:$0xff] %vm235_vm1, %v172_v33 }
  0xe7   :  { %247 = vst.msk [vmem:[%s503_s3 + $0x58] sm:$0xff] %vm235_vm1, %v212_v34  ;;  %238 = vst.msk [vmem:[%s503_s3 + $0x10] sm:$0xff] %vm235_vm1, %v167_v37  ;;  %v309_v39 = vpop.f32.mrb[4].mxu0 }
  0xe8   :  { %246 = vst.msk [vmem:[%s503_s3 + $0x50] sm:$0xff] %vm235_vm1, %v207_v38  ;;  %v321_v40 = vpop.f32.mrb[4].mxu1  ;;  %v182_v41 = vadd.f32 %v309_v39, %v256_v22  ;;  %v176_v43 = vpop.f32.mrb[5].mxu0 }
  0xe9   :  { %v222_v42 = vadd.f32 %v321_v40, %v256_v22  ;;  %v216_v44 = vpop.f32.mrb[5].mxu1  ;;  %v177_v45 = vadd.f32 %v256_v22, %v176_v43 }
  0xea   :  { %v217_v46 = vadd.f32 %v256_v22, %v216_v44  ;;  %241 = vst.msk [vmem:[%s503_s3 + $0x28] sm:$0xff] %vm235_vm1, %v182_v41 }
  0xeb   :  { %249 = vst.msk [vmem:[%s503_s3 + $0x68] sm:$0xff] %vm235_vm1, %v222_v42  ;;  %240 = vst.msk [vmem:[%s503_s3 + $0x20] sm:$0xff] %vm235_vm1, %v177_v45  ;;  %v312_v47 = vpop.f32.mrb[6].mxu0 }
  0xec   :  { %248 = vst.msk [vmem:[%s503_s3 + $0x60] sm:$0xff] %vm235_vm1, %v217_v46  ;;  %v324_v48 = vpop.f32.mrb[6].mxu1  ;;  %v192_v49 = vadd.f32 %v312_v47, %v256_v22  ;;  %v186_v51 = vpop.f32.mrb[7].mxu0 }
  0xed   :  { %v232_v50 = vadd.f32 %v324_v48, %v256_v22  ;;  %v226_v52 = vpop.f32.mrb[7].mxu1  ;;  %v187_v53 = vadd.f32 %v256_v22, %v186_v51 }
  0xee   :  { %v227_v54 = vadd.f32 %v256_v22, %v226_v52  ;;  %243 = vst.msk [vmem:[%s503_s3 + $0x38] sm:$0xff] %vm235_vm1, %v192_v49 }
  0xef   :  { %251 = vst.msk [vmem:[%s503_s3 + $0x78] sm:$0xff] %vm235_vm1, %v232_v50  ;;  %242 = vst.msk [vmem:[%s503_s3 + $0x30] sm:$0xff] %vm235_vm1, %v187_v53 }
  0xf0   :  { %250 = vst.msk [vmem:[%s503_s3 + $0x70] sm:$0xff] %vm235_vm1, %v227_v54 }

// kernel: transformer_forward.10
= control target key start
LH: loop header
LB: loop body
LE: loop exit
PB: predicated region body
PF: predicated region fallthrough
CT: control target
= control target key end

     0   :  { %vm41_vm0 = vcmask 261120   ;;  %s499_s1 = inlined_call_operand.vmem [shape: f32[32,32], index: 1, kind: input, shape index: {}]   ;;  %s500_s0 = inlined_call_operand.vmem [shape: f32[128,32], index: 0, kind: input, shape index: {}]   ;;  %s501_s2 = inlined_call_operand.vmem [shape: f32[1,32], index: 2, kind: input, shape index: {}]   ;;  %s502_s3 = inlined_call_operand.vmem [shape: f32[128,32], index: 3, kind: output, shape index: {}]  }
   0x1   :  { %v30_v0 = vld [vmem:[%s499_s1] sm:$0xff]  ;;  %v31_v1 = vld [vmem:[%s499_s1 + $0x8] sm:$0xff]  ;;  %v32_v2 = vld [vmem:[%s499_s1 + $0x10] sm:$0xff] }
   0x2   :  { %v324_v3 = vpack.c.bf16 %v31_v1, %v30_v0  ;;  %v33_v4 = vld [vmem:[%s499_s1 + $0x18] sm:$0xff]  ;;  %v14_v5 = vld [vmem:[%s500_s0] sm:$0xff]  ;;  %v15_v8 = vld [vmem:[%s500_s0 + $0x8] sm:$0xff] }
   0x3   :  { %v22_v6 = vld [vmem:[%s500_s0 + $0x40] sm:$0xff]  ;;  %v328_v7 = vpack.c.bf16 %v33_v4, %v32_v2  ;;  %300 = vmatprep.mubr.msk.f32.mxu0 %vm41_vm0, %v14_v5  ;;  %v23_v9 = vld [vmem:[%s500_s0 + $0x48] sm:$0xff]  ;;  %v16_v10 = vld [vmem:[%s500_s0 + $0x10] sm:$0xff] }
   0x4   :  { %312 = vmatprep.mubr.msk.f32.mxu1 %vm41_vm0, %v22_v6  ;;  %325 = vmatprep.subr.bf16.mxu0 %v324_v3  ;;  %v24_v11 = vld [vmem:[%s500_s0 + $0x50] sm:$0xff]  ;;  %v17_v12 = vld [vmem:[%s500_s0 + $0x18] sm:$0xff]  ;;  %v18_v14 = vld [vmem:[%s500_s0 + $0x20] sm:$0xff] }
   0x5   :  { %332 = vmatprep.subr.bf16.mxu1 %v324_v3  ;;  %327 = vmatpush3.bf16.msra.mxu0 %v324_v3  ;;  %v25_v13 = vld [vmem:[%s500_s0 + $0x58] sm:$0xff]  ;;  %v26_v15 = vld [vmem:[%s500_s0 + $0x60] sm:$0xff]  ;;  %v19_v16 = vld [vmem:[%s500_s0 + $0x28] sm:$0xff] }
   0x6   :  { %334 = vmatpush3.bf16.msra.mxu1 %v324_v3  ;;  %329 = vmatprep.subr.bf16.mxu0 %v328_v7  ;;  %v27_v17 = vld [vmem:[%s500_s0 + $0x68] sm:$0xff]  ;;  %v20_v18 = vld [vmem:[%s500_s0 + $0x30] sm:$0xff]  ;;  %v21_v20 = vld [vmem:[%s500_s0 + $0x38] sm:$0xff] }
   0x7   :  { %333 = vmatprep.subr.bf16.mxu1 %v328_v7  ;;  %v28_v19 = vld [vmem:[%s500_s0 + $0x70] sm:$0xff]  ;;  %v29_v21 = vld [vmem:[%s500_s0 + $0x78] sm:$0xff]  ;;  %v255_v22 = vld [vmem:[%s501_s2] ss:$0 sm:$0xff] }
   0x9   :  { %331 = vmatpush3.bf16.msra.mxu0 %v328_v7 }
   0xa   :  { %335 = vmatpush3.bf16.msra.mxu1 %v328_v7 }
   0xc   :  { %301 = vmatmul.mubr.msk.f32.vlgmr.msra.gmra.mrb[0].mxu0 %vm41_vm0, %v15_v8 }
   0xd   :  { %313 = vmatmul.mubr.msk.f32.vlgmr.msra.gmra.mrb[0].mxu1 %vm41_vm0, %v23_v9  ;;  %303 = vmatprep.mubr.msk.f32.mxu0 %vm41_vm0, %v16_v10 }
   0xe   :  { %315 = vmatprep.mubr.msk.f32.mxu1 %vm41_vm0, %v24_v11 }
  0x10   :  { %304 = vmatmul.mubr.msk.f32.gmra.mrb[2].mxu0 %vm41_vm0, %v17_v12 }
  0x11   :  { %316 = vmatmul.mubr.msk.f32.gmra.mrb[2].mxu1 %vm41_vm0, %v25_v13  ;;  %306 = vmatprep.mubr.msk.f32.mxu0 %vm41_vm0, %v18_v14 }
  0x12   :  { %318 = vmatprep.mubr.msk.f32.mxu1 %vm41_vm0, %v26_v15 }
  0x14   :  { %307 = vmatmul.mubr.msk.f32.gmra.mrb[4].mxu0 %vm41_vm0, %v19_v16 }
  0x15   :  { %319 = vmatmul.mubr.msk.f32.gmra.mrb[4].mxu1 %vm41_vm0, %v27_v17  ;;  %309 = vmatprep.mubr.msk.f32.mxu0 %vm41_vm0, %v20_v18 }
  0x16   :  { %321 = vmatprep.mubr.msk.f32.mxu1 %vm41_vm0, %v28_v19 }
  0x18   :  { %310 = vmatmul.mubr.msk.f32.gmra.mrb[6].mxu0 %vm41_vm0, %v21_v20 }
  0x19   :  { %322 = vmatmul.mubr.msk.f32.gmra.mrb[6].mxu1 %vm41_vm0, %v29_v21 }
  0xdf   :  { %v302_v23 = vpop.f32.mrb[0].mxu0 }
  0xe0   :  { %v314_v24 = vpop.f32.mrb[0].mxu1  ;;  %v162_v25 = vadd.f32 %v302_v23, %v255_v22  ;;  %v156_v27 = vpop.f32.mrb[1].mxu0 }
  0xe1   :  { %v202_v26 = vadd.f32 %v314_v24, %v255_v22  ;;  %v196_v28 = vpop.f32.mrb[1].mxu1  ;;  %v157_v29 = vadd.f32 %v255_v22, %v156_v27 }
  0xe2   :  { %v197_v30 = vadd.f32 %v255_v22, %v196_v28  ;;  %236 = vst.msk [vmem:[%s502_s3 + $0x8] sm:$0xff] %vm41_vm0, %v162_v25 }
  0xe3   :  { %244 = vst.msk [vmem:[%s502_s3 + $0x48] sm:$0xff] %vm41_vm0, %v202_v26  ;;  %235 = vst.msk [vmem:[%s502_s3] sm:$0xff] %vm41_vm0, %v157_v29  ;;  %v305_v31 = vpop.f32.mrb[2].mxu0 }
  0xe4   :  { %243 = vst.msk [vmem:[%s502_s3 + $0x40] sm:$0xff] %vm41_vm0, %v197_v30  ;;  %v317_v32 = vpop.f32.mrb[2].mxu1  ;;  %v172_v33 = vadd.f32 %v305_v31, %v255_v22  ;;  %v166_v35 = vpop.f32.mrb[3].mxu0 }
  0xe5   :  { %v212_v34 = vadd.f32 %v317_v32, %v255_v22  ;;  %v206_v36 = vpop.f32.mrb[3].mxu1  ;;  %v167_v37 = vadd.f32 %v255_v22, %v166_v35 }
  0xe6   :  { %v207_v38 = vadd.f32 %v255_v22, %v206_v36  ;;  %238 = vst.msk [vmem:[%s502_s3 + $0x18] sm:$0xff] %vm41_vm0, %v172_v33 }
  0xe7   :  { %246 = vst.msk [vmem:[%s502_s3 + $0x58] sm:$0xff] %vm41_vm0, %v212_v34  ;;  %237 = vst.msk [vmem:[%s502_s3 + $0x10] sm:$0xff] %vm41_vm0, %v167_v37  ;;  %v308_v39 = vpop.f32.mrb[4].mxu0 }
  0xe8   :  { %245 = vst.msk [vmem:[%s502_s3 + $0x50] sm:$0xff] %vm41_vm0, %v207_v38  ;;  %v320_v40 = vpop.f32.mrb[4].mxu1  ;;  %v182_v41 = vadd.f32 %v308_v39, %v255_v22  ;;  %v176_v43 = vpop.f32.mrb[5].mxu0 }
  0xe9   :  { %v222_v42 = vadd.f32 %v320_v40, %v255_v22  ;;  %v216_v44 = vpop.f32.mrb[5].mxu1  ;;  %v177_v45 = vadd.f32 %v255_v22, %v176_v43 }
  0xea   :  { %v217_v46 = vadd.f32 %v255_v22, %v216_v44  ;;  %240 = vst.msk [vmem:[%s502_s3 + $0x28] sm:$0xff] %vm41_vm0, %v182_v41 }
  0xeb   :  { %248 = vst.msk [vmem:[%s502_s3 + $0x68] sm:$0xff] %vm41_vm0, %v222_v42  ;;  %239 = vst.msk [vmem:[%s502_s3 + $0x20] sm:$0xff] %vm41_vm0, %v177_v45  ;;  %v311_v47 = vpop.f32.mrb[6].mxu0 }
  0xec   :  { %247 = vst.msk [vmem:[%s502_s3 + $0x60] sm:$0xff] %vm41_vm0, %v217_v46  ;;  %v323_v48 = vpop.f32.mrb[6].mxu1  ;;  %v192_v49 = vadd.f32 %v311_v47, %v255_v22  ;;  %v186_v51 = vpop.f32.mrb[7].mxu0 }
  0xed   :  { %v232_v50 = vadd.f32 %v323_v48, %v255_v22  ;;  %v226_v52 = vpop.f32.mrb[7].mxu1  ;;  %v187_v53 = vadd.f32 %v255_v22, %v186_v51 }
  0xee   :  { %v227_v54 = vadd.f32 %v255_v22, %v226_v52  ;;  %242 = vst.msk [vmem:[%s502_s3 + $0x38] sm:$0xff] %vm41_vm0, %v192_v49 }
  0xef   :  { %250 = vst.msk [vmem:[%s502_s3 + $0x78] sm:$0xff] %vm41_vm0, %v232_v50  ;;  %241 = vst.msk [vmem:[%s502_s3 + $0x30] sm:$0xff] %vm41_vm0, %v187_v53 }
  0xf0   :  { %249 = vst.msk [vmem:[%s502_s3 + $0x70] sm:$0xff] %vm41_vm0, %v227_v54 }

// kernel: transformer_forward.9
= control target key start
LH: loop header
LB: loop body
LE: loop exit
PB: predicated region body
PF: predicated region fallthrough
CT: control target
= control target key end

     0   :  { %s941_s12 = smov 0   ;;  %s1070_s0 = inlined_call_operand.vmem [shape: f32[8,64,8], index: 0, kind: input, shape index: {}]   ;;  %s1071_s1 = inlined_call_operand.vmem [shape: f32[8,64,8], index: 1, kind: input, shape index: {}]   ;;  %s1072_s2 = inlined_call_operand.vmem [shape: f32[8,64,8], index: 2, kind: input, shape index: {}]   ;;  %s1073_s3 = inlined_call_operand.vmem [shape: f32[8,64,8], index: 3, kind: output, shape index: {}]  }
   0x1 LB: > { %s702_s13 = sadd.s32 4294967295, %s919_s12   ;;  %p706_p0 = scmp.ge.s32.totalorder %s919_s12, 1  ;;  %s919_s12 = sphi %s941_s12, %s13_s12  }
   0x2   : > { %p157_p1 = scmp.lt.s32.totalorder %s919_s12, 9 }
   0x4   : > { %p158_p2 = pnand %p706_p0, %p157_p1 }
   0x5   : > { %p191_p3 = scmp.lt.s32.totalorder (!%p158_p2), %s702_s13, 7  ;;  %vm243_vm0 = vcmask (!%p158_p2), 64512   ;;  %vm397_vm2 = vcmask (!%p158_p2), 523264  }
   0x6   : > { %161 = sbr.rel (%p158_p2) target bundleno = 808 (0x328), region = 32  ;;  %vm957_vm1 = vmpackc.low (!%p158_p2), %vm243_vm0, %vm243_vm0 }
   0xd   : > { %s1077_s13 = smov (!%p191_p3, %s702_s13), 7 }
   0xe   : > { %s949_s14 = sshll.u32 %s1077_s13, 6 }
   0xf   : > { %s200_s17 = scalar_lea.vmem %s1071_s1, %s949_s14  ;;  %s965_s20 = scalar_lea.vmem %s1070_s0, %s949_s14 }
  0x10   : > { %v227_v1 = vld [vmem:[%s200_s17] sm:$0xff]  ;;  %v228_v2 = vld [vmem:[%s200_s17 + $0x8] sm:$0xff]  ;;  %v229_v3 = vld [vmem:[%s200_s17 + $0x10] sm:$0xff]  ;;  %s205_s23 = scalar_lea.vmem %s1072_s2, %s949_s14  ;;  %s210_s26 = scalar_lea.vmem %s1073_s3, %s949_s14 }
  0x11   : > { %v833_v4 = vpack.c.bf16 %v228_v2, %v227_v1  ;;  %v230_v5 = vld [vmem:[%s200_s17 + $0x18] sm:$0xff]  ;;  %v211_v7 = vld [vmem:[%s965_s20] sm:$0xff]  ;;  %v232_v10 = vld [vmem:[%s200_s17 + $0x28] sm:$0xff] }
  0x12   : > { %v839_v6 = vpack.c.bf16 %v230_v5, %v229_v3  ;;  %v219_v8 = vmul.f32 0.35355338, %v211_v7  ;;  %v231_v9 = vld [vmem:[%s200_s17 + $0x20] sm:$0xff]  ;;  %v233_v12 = vld [vmem:[%s200_s17 + $0x30] sm:$0xff]  ;;  %v234_v13 = vld [vmem:[%s200_s17 + $0x38] sm:$0xff] }
  0x13   : > { %835 = vmatprep.subr.msk.bf16.mxu0 %vm957_vm1, %v833_v4  ;;  %v845_v11 = vpack.c.bf16 %v232_v10, %v231_v9  ;;  %v851_v14 = vpack.c.bf16 %v234_v13, %v233_v12  ;;  %v212_v15 = vld [vmem:[%s965_s20 + $0x8] sm:$0xff]  ;;  %v213_v16 = vld [vmem:[%s965_s20 + $0x10] sm:$0xff]  ;;  %v214_v19 = vld [vmem:[%s965_s20 + $0x18] sm:$0xff] }
  0x14   : > { %838 = vmatpush3.bf16.xpose.msk.msra.mxu0 %vm957_vm1, %v833_v4  ;;  %793 = vmatprep.mubr.msk.f32.mxu0 %vm243_vm0, %v219_v8  ;;  %v220_v17 = vmul.f32 0.35355338, %v212_v15  ;;  %v221_v18 = vmul.f32 0.35355338, %v213_v16  ;;  %v215_v20 = vld [vmem:[%s965_s20 + $0x20] sm:$0xff]  ;;  %v216_v23 = vld [vmem:[%s965_s20 + $0x28] sm:$0xff] }
  0x15   : > { %841 = vmatprep.subr.msk.bf16.mxu0 %vm957_vm1, %v839_v6  ;;  %v222_v21 = vmul.f32 0.35355338, %v214_v19  ;;  %v223_v22 = vmul.f32 0.35355338, %v215_v20  ;;  %v217_v24 = vld [vmem:[%s965_s20 + $0x30] sm:$0xff]  ;;  %v218_v27 = vld [vmem:[%s965_s20 + $0x38] sm:$0xff] }
  0x16   : > { %v224_v25 = vmul.f32 0.35355338, %v216_v23  ;;  %v225_v26 = vmul.f32 0.35355338, %v217_v24  ;;  %v226_v28 = vmul.f32 0.35355338, %v218_v27 }
  0x17   : > { %v235_v19 = vld [vmem:[%s205_s23] sm:$0xff]  ;;  %v236_v20 = vld [vmem:[%s205_s23 + $0x8] sm:$0xff]  ;;  %v237_v24 = vld [vmem:[%s205_s23 + $0x10] sm:$0xff] }
  0x18   : > { %v239_v27 = vld [vmem:[%s205_s23 + $0x20] sm:$0xff] }
  0x1c   : > { %844 = vmatpush3.bf16.xpose.msk.msra.mxu0 %vm957_vm1, %v839_v6 }
  0x1d   : > { %847 = vmatprep.subr.msk.bf16.mxu0 %vm957_vm1, %v845_v11 }
  0x24   : > { %850 = vmatpush3.bf16.xpose.msk.msra.mxu0 %vm957_vm1, %v845_v11 }
  0x25   : > { %853 = vmatprep.subr.msk.bf16.mxu0 %vm957_vm1, %v851_v14 }
  0x2c   : > { %856 = vmatpush3.bf16.xpose.msk.msra.mxu0 %vm957_vm1, %v851_v14 }
  0x33   : > { %794 = vmatmul.mubr.msk.f32.vlgmr.msra.gmra.mrb[0].mxu0 %vm243_vm0, %v220_v17 }
  0x34   : > { %796 = vmatprep.mubr.msk.f32.mxu0 %vm243_vm0, %v221_v18 }
  0x37   : > { %797 = vmatmul.mubr.msk.f32.gmra.mrb[2].mxu0 %vm243_vm0, %v222_v21 }
  0x38   : > { %799 = vmatprep.mubr.msk.f32.mxu0 %vm243_vm0, %v223_v22  ;;  %v857_v22 = vpack.c.bf16 %v236_v20, %v235_v19 }
  0x3a   : > { %858 = vmatprep.subr.bf16.mxu1 %v857_v22 }
  0x3b   : > { %800 = vmatmul.mubr.msk.f32.gmra.mrb[4].mxu0 %vm243_vm0, %v224_v25  ;;  %860 = vmatpush3.bf16.msra.mxu1 %v857_v22  ;;  %v238_v25 = vld [vmem:[%s205_s23 + $0x18] sm:$0xff] }
  0x3c   : > { %802 = vmatprep.mubr.msk.f32.mxu0 %vm243_vm0, %v225_v26  ;;  %v861_v26 = vpack.c.bf16 %v238_v25, %v237_v24 }
  0x3e   : > { %862 = vmatprep.subr.bf16.mxu1 %v861_v26 }
  0x3f   : > { %803 = vmatmul.mubr.msk.f32.gmra.mrb[6].mxu0 %vm243_vm0, %v226_v28  ;;  %864 = vmatpush3.bf16.msra.mxu1 %v861_v26  ;;  %v240_v28 = vld [vmem:[%s205_s23 + $0x28] sm:$0xff] }
 0x106   : > { %v795_v29 = vpop.f32.mrb[0].mxu0 }
 0x107   : > { %v358_v30 = vpop.f32.mrb[1].mxu0  ;;  %v401_v34 = vsel %vm397_vm2, %v795_v29, -inf }
 0x108   : > { %v398_v31 = vsel %vm397_vm2, %v358_v30, -inf }
 0x109   : > { %399 = vmax.xlane.f32.xlu0 %v398_v31  ;;  %v242_v31 = vld [vmem:[%s205_s23 + $0x38] sm:$0xff] }
 0x10a   : > { %v798_v32 = vpop.f32.mrb[2].mxu0 }
 0x10b   : > { %v368_v33 = vpop.f32.mrb[3].mxu0  ;;  %v407_v38 = vsel %vm397_vm2, %v798_v32, -inf }
 0x10c   : > { %v404_v35 = vsel %vm397_vm2, %v368_v33, -inf }
 0x10d   : > { %402 = vmax.xlane.f32.xlu0 %v401_v34  ;;  %405 = vmax.xlane.f32.xlu1 %v404_v35 }
 0x10e   : > { %v801_v36 = vpop.f32.mrb[4].mxu0 }
 0x10f   : > { %v378_v37 = vpop.f32.mrb[5].mxu0  ;;  %v413_v42 = vsel %vm397_vm2, %v801_v36, -inf }
 0x110   : > { %v410_v39 = vsel %vm397_vm2, %v378_v37, -inf }
 0x111   : > { %408 = vmax.xlane.f32.xlu1 %v407_v38  ;;  %411 = vmax.xlane.f32.xlu0 %v410_v39 }
 0x112   : > { %v804_v40 = vpop.f32.mrb[6].mxu0 }
 0x113   : > { %v388_v41 = vpop.f32.mrb[7].mxu0  ;;  %v419_v44 = vsel %vm397_vm2, %v804_v40, -inf }
 0x114   : > { %v416_v43 = vsel %vm397_vm2, %v388_v41, -inf }
 0x115   : > { %414 = vmax.xlane.f32.xlu1 %v413_v42  ;;  %417 = vmax.xlane.f32.xlu0 %v416_v43 }
 0x119   : > { %420 = vmax.xlane.f32.xlu1 %v419_v44 }
 0x196   : > { %v400_v45 = vpop.xlane.xlu0 %399 }
 0x197   : > { %v422_v46 = vsub.f32 %v358_v30, %v400_v45  ;;  %v241_v30 = vld [vmem:[%s205_s23 + $0x30] sm:$0xff] }
 0x199   : > { %v430_v47 = vmul.f32 1.442695, %v422_v46 }
 0x19a   : > { %v403_v48 = vpop.xlane.xlu0 %402  ;;  %v406_v49 = vpop.xlane.xlu1 %405 }
 0x19b   : > { %881 = vpow2.f32 %v430_v47  ;;  %v423_v50 = vsub.f32 %v795_v29, %v403_v48  ;;  %v424_v51 = vsub.f32 %v368_v33, %v406_v49  ;;  %v865_v29 = vpack.c.bf16 %v240_v28, %v239_v27 }
 0x19d   : > { %v432_v52 = vmul.f32 1.442695, %v423_v50  ;;  %v434_v53 = vmul.f32 1.442695, %v424_v51  ;;  %866 = vmatprep.subr.bf16.mxu1 %v865_v29 }
 0x19e   : > { %v409_v54 = vpop.xlane.xlu1 %408  ;;  %v412_v55 = vpop.xlane.xlu0 %411  ;;  %868 = vmatpush3.bf16.msra.mxu1 %v865_v29 }
 0x19f   : > { %883 = vpow2.f32 %v432_v52  ;;  %v425_v56 = vsub.f32 %v798_v32, %v409_v54  ;;  %v426_v57 = vsub.f32 %v378_v37, %v412_v55  ;;  %v869_v32 = vpack.c.bf16 %v242_v31, %v241_v30 }
 0x1a0   : > { %885 = vpow2.f32 %v434_v53 }
 0x1a1   : > { %v436_v58 = vmul.f32 1.442695, %v425_v56  ;;  %v438_v59 = vmul.f32 1.442695, %v426_v57  ;;  %870 = vmatprep.subr.bf16.mxu1 %v869_v32 }
 0x1a2   : > { %v415_v60 = vpop.xlane.xlu1 %414  ;;  %v418_v61 = vpop.xlane.xlu0 %417  ;;  %872 = vmatpush3.bf16.msra.mxu1 %v869_v32 }
 0x1a3   : > { %887 = vpow2.f32 %v436_v58  ;;  %v427_v62 = vsub.f32 %v801_v36, %v415_v60  ;;  %v428_v63 = vsub.f32 %v388_v41, %v418_v61 }
 0x1a4   : > { %889 = vpow2.f32 %v438_v59 }
 0x1a5   : > { %v1007_v0 = vpop.eup %881  ;;  %v440_v1 = vmul.f32 1.442695, %v427_v62  ;;  %v442_v2 = vmul.f32 1.442695, %v428_v63 }
 0x1a6   : > { %v421_v3 = vpop.xlane.xlu1 %420  ;;  %v446_v4 = vsel %vm397_vm2, %v1007_v0, 0.0 }
 0x1a7   : > { %891 = vpow2.f32 %v440_v1  ;;  %v429_v5 = vsub.f32 %v804_v40, %v421_v3  ;;  %447 = vadd.xlane.f32.xlu0 %v446_v4 }
 0x1a8   : > { %893 = vpow2.f32 %v442_v2 }
 0x1a9   : > { %v1011_v6 = vpop.eup %883  ;;  %v444_v7 = vmul.f32 1.442695, %v429_v5 }
 0x1aa   : > { %v1013_v8 = vpop.eup %885  ;;  %v449_v9 = vsel %vm397_vm2, %v1011_v6, 0.0 }
 0x1ab   : > { %895 = vpow2.f32 %v444_v7  ;;  %450 = vadd.xlane.f32.xlu1 %v449_v9  ;;  %v452_v10 = vsel %vm397_vm2, %v1013_v8, 0.0 }
 0x1ac   : > { %453 = vadd.xlane.f32.xlu0 %v452_v10 }
 0x1ad   : > { %v1019_v11 = vpop.eup %887 }
 0x1ae   : > { %v1021_v12 = vpop.eup %889  ;;  %v455_v13 = vsel %vm397_vm2, %v1019_v11, 0.0 }
 0x1af   : > { %456 = vadd.xlane.f32.xlu1 %v455_v13  ;;  %v458_v14 = vsel %vm397_vm2, %v1021_v12, 0.0 }
 0x1b0   : > { %459 = vadd.xlane.f32.xlu0 %v458_v14 }
 0x1b1   : > { %v1027_v15 = vpop.eup %891 }
 0x1b2   : > { %v1029_v16 = vpop.eup %893  ;;  %v461_v17 = vsel %vm397_vm2, %v1027_v15, 0.0 }
 0x1b3   : > { %462 = vadd.xlane.f32.xlu1 %v461_v17  ;;  %v464_v18 = vsel %vm397_vm2, %v1029_v16, 0.0 }
 0x1b4   : > { %465 = vadd.xlane.f32.xlu0 %v464_v18 }
 0x1b5   : > { %v896_v21 = vpop.eup %895 }
 0x1b6   : > { %v467_v23 = vsel %vm397_vm2, %v896_v21, 0.0 }
 0x1b7   : > { %468 = vadd.xlane.f32.xlu1 %v467_v23 }
 0x234   : > { %v448_v33 = vpop.xlane.xlu0 %447 }
 0x235   : > { %897 = vrcp.f32 %v448_v33 }
 0x238   : > { %v451_v34 = vpop.xlane.xlu1 %450 }
 0x239   : > { %899 = vrcp.f32 %v451_v34  ;;  %v454_v35 = vpop.xlane.xlu0 %453 }
 0x23a   : > { %901 = vrcp.f32 %v454_v35 }
 0x23c   : > { %v457_v36 = vpop.xlane.xlu1 %456 }
 0x23d   : > { %903 = vrcp.f32 %v457_v36  ;;  %v460_v37 = vpop.xlane.xlu0 %459 }
 0x23e   : > { %905 = vrcp.f32 %v460_v37 }
 0x23f   : > { %v898_v38 = vpop.eup %897 }
 0x240   : > { %v463_v39 = vpop.xlane.xlu1 %462  ;;  %v471_v40 = vmul.f32 %v898_v38, %v1007_v0 }
 0x241   : > { %907 = vrcp.f32 %v463_v39  ;;  %v466_v41 = vpop.xlane.xlu0 %465 }
 0x242   : > { %909 = vrcp.f32 %v466_v41  ;;  %821 = vmatprep.mubr.msk.f32.mxu1 %vm397_vm2, %v471_v40 }
 0x243   : > { %v900_v42 = vpop.eup %899 }
 0x244   : > { %v902_v43 = vpop.eup %901  ;;  %v469_v44 = vpop.xlane.xlu1 %468  ;;  %v473_v45 = vmul.f32 %v900_v42, %v1011_v6 }
 0x245   : > { %911 = vrcp.f32 %v469_v44  ;;  %v475_v46 = vmul.f32 %v902_v43, %v1013_v8 }
 0x246   : > { %822 = vmatmul.mubr.msk.f32.vlgmr.msra.gmra.mrb[0].mxu1 %vm397_vm2, %v473_v45 }
 0x247   : > { %v904_v47 = vpop.eup %903  ;;  %824 = vmatprep.mubr.msk.f32.mxu1 %vm397_vm2, %v475_v46 }
 0x248   : > { %v906_v48 = vpop.eup %905  ;;  %v477_v49 = vmul.f32 %v904_v47, %v1019_v11 }
 0x249   : > { %v479_v50 = vmul.f32 %v906_v48, %v1021_v12 }
 0x24a   : > { %825 = vmatmul.mubr.msk.f32.gmra.mrb[2].mxu1 %vm397_vm2, %v477_v49 }
 0x24b   : > { %v908_v51 = vpop.eup %907  ;;  %827 = vmatprep.mubr.msk.f32.mxu1 %vm397_vm2, %v479_v50 }
 0x24c   : > { %v910_v52 = vpop.eup %909  ;;  %v481_v53 = vmul.f32 %v908_v51, %v1027_v15 }
 0x24d   : > { %v483_v54 = vmul.f32 %v910_v52, %v1029_v16 }
 0x24e   : > { %828 = vmatmul.mubr.msk.f32.gmra.mrb[4].mxu1 %vm397_vm2, %v481_v53 }
 0x24f   : > { %v912_v55 = vpop.eup %911  ;;  %830 = vmatprep.mubr.msk.f32.mxu1 %vm397_vm2, %v483_v54 }
 0x250   : > { %v485_v56 = vmul.f32 %v912_v55, %v896_v21 }
 0x252   : > { %831 = vmatmul.mubr.msk.f32.gmra.mrb[6].mxu1 %vm397_vm2, %v485_v56 }
 0x319   : > { %v823_v57 = vpop.f32.mrb[0].mxu1 }
 0x31a   : > { %616 = vst.msk [vmem:[%s210_s26 + $0x8] sm:$0xff] %vm243_vm0, %v823_v57  ;;  %v576_v58 = vpop.f32.mrb[1].mxu1 }
 0x31b   : > { %615 = vst.msk [vmem:[%s210_s26] sm:$0xff] %vm243_vm0, %v576_v58 }
 0x31d   : > { %v826_v59 = vpop.f32.mrb[2].mxu1 }
 0x31e   : > { %618 = vst.msk [vmem:[%s210_s26 + $0x18] sm:$0xff] %vm243_vm0, %v826_v59  ;;  %v586_v60 = vpop.f32.mrb[3].mxu1 }
 0x31f   : > { %617 = vst.msk [vmem:[%s210_s26 + $0x10] sm:$0xff] %vm243_vm0, %v586_v60 }
 0x321   : > { %v829_v61 = vpop.f32.mrb[4].mxu1 }
 0x322   : > { %620 = vst.msk [vmem:[%s210_s26 + $0x28] sm:$0xff] %vm243_vm0, %v829_v61  ;;  %v596_v62 = vpop.f32.mrb[5].mxu1 }
 0x323   : > { %619 = vst.msk [vmem:[%s210_s26 + $0x20] sm:$0xff] %vm243_vm0, %v596_v62 }
 0x325   : > { %v832_v63 = vpop.f32.mrb[6].mxu1 }
 0x326   : > { %622 = vst.msk [vmem:[%s210_s26 + $0x38] sm:$0xff] %vm243_vm0, %v832_v63  ;;  %v606_v0 = vpop.f32.mrb[7].mxu1 }
 0x327   : > { %621 = vst.msk [vmem:[%s210_s26 + $0x30] sm:$0xff] %vm243_vm0, %v606_v0 }
 0x328 PF: > { %s13_s12 = sadd.s32 1, %s919_s12  }
 0x329   : > { %p10_p4 = scmp.ge.s32.totalorder %s13_s12, 10  }
 0x32b   :  { %12 = sbr.rel (!%p10_p4) target bundleno = 1 (0x1), region = 68 }

// kernel: transformer_forward.11
= control target key start
LH: loop header
LB: loop body
LE: loop exit
PB: predicated region body
PF: predicated region fallthrough
CT: control target
= control target key end

     0   :  { %v152_v8 = vmov 0   ;;  %s238_s1 = inlined_call_operand.vmem [shape: f32[32,128], index: 1, kind: input, shape index: {}]   ;;  %s239_s2 = inlined_call_operand.vmem [shape: f32[32,1], index: 2, kind: input, shape index: {}]   ;;  %s240_s3 = inlined_call_operand.vmem [shape: f32[32,1], index: 3, kind: input, shape index: {}]   ;;  %s241_s0 = inlined_call_operand.vmem [shape: f32[32,128], index: 0, kind: input, shape index: {}]   ;;  %s242_s4 = inlined_call_operand.vmem [shape: f32[32,128], index: 4, kind: output, shape index: {}]  }
   0x1   :  { %v17_v0 = vld [vmem:[%s238_s1] sm:$0xff]  ;;  %v19_v1 = vld [vmem:[%s238_s1 + $0x10] sm:$0xff]  ;;  %v18_v2 = vld [vmem:[%s238_s1 + $0x8] sm:$0xff]  ;;  %143 = vset.pattern.permute.xlu1 %v152_v8  ;;  %142 = vset.pattern.permute.xlu0 %v152_v8 }
   0x2   :  { %v21_v3 = vmax.f32 %v17_v0, 0.0  ;;  %v23_v4 = vmax.f32 %v19_v1, 0.0  ;;  %v20_v5 = vld [vmem:[%s238_s1 + $0x18] sm:$0xff]  ;;  %v22_v6 = vmax.f32 %v18_v2, 0.0  ;;  %v70_v21 = vld [vmem:[%s239_s2 + $0x8] sm:$0xff]  ;;  %v71_v22 = vld [vmem:[%s239_s2 + $0x10] sm:$0xff] }
   0x3   :  { %v24_v7 = vmax.f32 %v20_v5, 0.0  ;;  %v69_v23 = vld [vmem:[%s239_s2] sm:$0xff]  ;;  %v72_v24 = vld [vmem:[%s239_s2 + $0x18] sm:$0xff]  ;;  %v98_v26 = vld [vmem:[%s240_s3 + $0x8] sm:$0xff] }
   0x4   :  { %25 = vadd.xlane.f32.xlu0 %v21_v3  ;;  %29 = vadd.xlane.f32.xlu1 %v23_v4  ;;  %v97_v25 = vld [vmem:[%s240_s3] sm:$0xff]  ;;  %v99_v27 = vld [vmem:[%s240_s3 + $0x10] sm:$0xff]  ;;  %v100_v32 = vld [vmem:[%s240_s3 + $0x18] sm:$0xff] }
   0x5   :  { %v125_v53 = vld [vmem:[%s241_s0] sm:$0xff]  ;;  %v126_v59 = vld [vmem:[%s241_s0 + $0x8] sm:$0xff]  ;;  %v127_v0 = vld [vmem:[%s241_s0 + $0x10] sm:$0xff] }
   0x8   :  { %27 = vadd.xlane.f32.xlu0 %v22_v6  ;;  %31 = vadd.xlane.f32.xlu1 %v24_v7 }
  0x91   :  { %v26_v9 = vpop.xlane.xlu0 %25  ;;  %v30_v10 = vpop.xlane.xlu1 %29 }
  0x92   :  { %v33_v11 = vmul.f32 0.0078125, %v26_v9  ;;  %v35_v12 = vmul.f32 0.0078125, %v30_v10  ;;  %v128_v10 = vld [vmem:[%s241_s0 + $0x18] sm:$0xff] }
  0x94   :  { %v37_v13 = vsub.f32 %v21_v3, %v33_v11  ;;  %v39_v14 = vsub.f32 %v23_v4, %v35_v12 }
  0x95   :  { %v28_v15 = vpop.xlane.xlu0 %27  ;;  %v32_v28 = vpop.xlane.xlu1 %31 }
  0x96   :  { %v34_v16 = vmul.f32 0.0078125, %v28_v15  ;;  %v41_v17 = vmul.f32 %v37_v13, %v37_v13  ;;  %v43_v19 = vmul.f32 %v39_v14, %v39_v14  ;;  %v36_v29 = vmul.f32 0.0078125, %v32_v28 }
  0x98   :  { %v38_v18 = vsub.f32 %v22_v6, %v34_v16  ;;  %45 = vadd.xlane.f32.xlu0 %v41_v17  ;;  %v40_v30 = vsub.f32 %v24_v7, %v36_v29 }
  0x9a   :  { %v42_v20 = vmul.f32 %v38_v18, %v38_v18  ;;  %v44_v31 = vmul.f32 %v40_v30, %v40_v30 }
  0x9c   :  { %49 = vadd.xlane.f32.xlu0 %v43_v19  ;;  %47 = vadd.xlane.f32.xlu1 %v42_v20 }
  0xad   :  { %80 = vperm.xlu1 %143, %v70_v21  }
  0xb1   :  { %85 = vperm.xlu1 %143, %v71_v22  }
  0xb2   :  { %75 = vperm.xlu0 %142, %v69_v23  }
  0xb5   :  { %90 = vperm.xlu1 %143, %v72_v24  }
  0xb9   :  { %103 = vperm.xlu1 %143, %v97_v25  }
  0xbd   :  { %108 = vperm.xlu1 %143, %v98_v26  }
  0xc1   :  { %113 = vperm.xlu1 %143, %v99_v27  }
  0xe5   :  { %51 = vadd.xlane.f32.xlu1 %v44_v31 }
  0xf6   :  { %118 = vperm.xlu1 %143, %v100_v32  }
 0x125   :  { %v46_v33 = vpop.xlane.xlu0 %45 }
 0x126   :  { %v53_v34 = vmul.f32 0.0078125, %v46_v33 }
 0x128   :  { %v57_v35 = vadd.f32 1e-05, %v53_v34 }
 0x129   :  { %v48_v36 = vpop.xlane.xlu1 %47  ;;  %v50_v37 = vpop.xlane.xlu0 %49 }
 0x12a   :  { %144 = vrsqrt.f32 %v57_v35  ;;  %v54_v38 = vmul.f32 0.0078125, %v48_v36  ;;  %v55_v39 = vmul.f32 0.0078125, %v50_v37 }
 0x12c   :  { %v58_v40 = vadd.f32 1e-05, %v54_v38  ;;  %v59_v41 = vadd.f32 1e-05, %v55_v39 }
 0x12d   :  { %v81_v42 = vpop.permute.xlu1 %80 }
 0x12e   :  { %146 = vrsqrt.f32 %v58_v40 }
 0x12f   :  { %148 = vrsqrt.f32 %v59_v41 }
 0x131   :  { %v86_v43 = vpop.permute.xlu1 %85  ;;  %v76_v45 = vpop.permute.xlu0 %75 }
 0x134   :  { %v145_v44 = vpop.eup %144 }
 0x135   :  { %v91_v46 = vpop.permute.xlu1 %90  ;;  %v65_v47 = vmul.f32 %v145_v44, %v37_v13 }
 0x137   :  { %v93_v48 = vmul.f32 %v76_v45, %v65_v47 }
 0x138   :  { %v147_v49 = vpop.eup %146 }
 0x139   :  { %v149_v50 = vpop.eup %148  ;;  %v66_v51 = vmul.f32 %v147_v49, %v38_v18  ;;  %v104_v52 = vpop.permute.xlu1 %103 }
 0x13a   :  { %v121_v54 = vadd.f32 %v104_v52, %v93_v48  ;;  %v67_v56 = vmul.f32 %v149_v50, %v39_v14 }
 0x13b   :  { %v94_v55 = vmul.f32 %v81_v42, %v66_v51 }
 0x13c   :  { %v129_v57 = vadd.f32 %v125_v53, %v121_v54  ;;  %v95_v61 = vmul.f32 %v86_v43, %v67_v56 }
 0x13d   :  { %v109_v58 = vpop.permute.xlu1 %108 }
 0x13e   :  { %133 = vst [vmem:[%s242_s4] sm:$0xff] %v129_v57  ;;  %v122_v60 = vadd.f32 %v109_v58, %v94_v55 }
 0x140   :  { %v130_v62 = vadd.f32 %v126_v59, %v122_v60 }
 0x141   :  { %v114_v63 = vpop.permute.xlu1 %113 }
 0x142   :  { %134 = vst [vmem:[%s242_s4 + $0x8] sm:$0xff] %v130_v62  ;;  %v123_v1 = vadd.f32 %v114_v63, %v95_v61 }
 0x144   :  { %v131_v2 = vadd.f32 %v127_v0, %v123_v1 }
 0x146   :  { %135 = vst [vmem:[%s242_s4 + $0x10] sm:$0xff] %v131_v2 }
 0x172   :  { %v52_v3 = vpop.xlane.xlu1 %51 }
 0x173   :  { %v56_v4 = vmul.f32 0.0078125, %v52_v3 }
 0x175   :  { %v60_v5 = vadd.f32 1e-05, %v56_v4 }
 0x176   :  { %v119_v9 = vpop.permute.xlu1 %118 }
 0x177   :  { %150 = vrsqrt.f32 %v60_v5 }
 0x181   :  { %v151_v6 = vpop.eup %150 }
 0x182   :  { %v68_v7 = vmul.f32 %v151_v6, %v40_v30 }
 0x184   :  { %v96_v8 = vmul.f32 %v91_v46, %v68_v7 }
 0x186   :  { %v124_v11 = vadd.f32 %v119_v9, %v96_v8 }
 0x188   :  { %v132_v12 = vadd.f32 %v128_v10, %v124_v11 }
 0x18a   :  { %136 = vst [vmem:[%s242_s4 + $0x18] sm:$0xff] %v132_v12 }

</bundles_post_ra>
